<compile_context>
chip_gen: v7x
topology: tpu7x:2x2x1
jax: 0.10.0
libtpu: 0.0.40
codegen_flags: <defaults>
</compile_context>

<pallas_src>
import jax
import jax.numpy as jnp
from jax import lax
from jax.experimental import pallas as pl
from jax.experimental.pallas import tpu as pltpu

LANE = 128


# ----------------------------- Pallas kernel --------------------------------

def _embed_kernel(x_ref, w_ref, b_ref, o_ref):
    # x: [C, tT]   slab of the NCL input for one batch element
    # w: [C, Dp]   full pre-transposed conv weight (VMEM resident)
    # b: [1, Dp]   bias row
    # o: [tT, Dp]  output tile of the [B, T, D] result
    #
    # Dim-0 contraction on both operands (no host transpose, no in-kernel .T).
    # K = C (~32) is tiny, so MXU utilization is irrelevant; the kernel is
    # HBM-write bound and the dot is essentially free filler.
    acc = lax.dot_general(
        x_ref[...], w_ref[...],
        dimension_numbers=(((0,), (0,)), ((), ())),
        preferred_element_type=jnp.float32,
    )
    o_ref[...] = (acc + b_ref[...]).astype(o_ref.dtype)


# ------------------------------- tiling --------------------------------------

def _round_up(n, m):
    return ((n + m - 1) // m) * m


def _pick_t_tile(T, max_rows):
    """Return (tT, T_pad).  tT is a 128-multiple dividing T_pad (lane/sublane
    friendly), or the full T for small non-128-multiple T.  Large odd T is
    padded instead of becoming one huge masked tile."""
    if T % LANE != 0 and T <= min(512, max_rows):
        return T, T                      # small full-dim tile (valid block)
    T_pad = T if T % LANE == 0 else _round_up(T, LANE)
    cap = max(LANE, min(max_rows, 2048))
    cap = (cap // LANE) * LANE
    t = cap
    while t >= LANE:
        if T_pad % t == 0:
            return t, T_pad
        t -= LANE
    return LANE, T_pad                   # unreachable: T_pad % 128 == 0


# ------------------------------- wrapper -------------------------------------

def vampnet_embedding(latents, w_cd, bias_row, out_dtype=None):
    """latents: [B, C, T]; w_cd: [C, D] (pre-transposed Conv1d weight);
    bias_row: [1, D]  ->  [B, T, D]  (== Conv1d(k=1) then transpose(1, 2)).

    out_dtype=jnp.bfloat16 halves the dominant output HBM traffic (accumulation
    stays fp32 on the MXU); default keeps the input dtype for exact parity."""
    B, C, T = latents.shape
    D = w_cd.shape[1]
    out_dtype = latents.dtype if out_dtype is None else out_dtype

    x_isz = jnp.dtype(latents.dtype).itemsize
    w_isz = jnp.dtype(w_cd.dtype).itemsize
    o_isz = jnp.dtype(out_dtype).itemsize

    # --- pad D to a 128 multiple -> lane-dense, unmasked output stores -------
    D_pad = D if D % LANE == 0 else _round_up(D, LANE)

    # --- VMEM-budgeted T tile (double-buffered x + out tiles + resident w) ---
    budget = 24 * 1024 * 1024                         # safe on v7x 64 MiB VMEM
    w_resident = 2 * (C * D_pad * w_isz + D_pad * w_isz)
    per_row = 2 * (D_pad * o_isz + C * x_isz)
    max_rows = max(8, (budget - w_resident) // per_row)
    tT, T_pad = _pick_t_tile(T, max_rows)

    # --- keep >=2 parallel grid steps so v7x megacore can split work ---------
    nT = T_pad // tT
    if B * nT < 2 and tT % (2 * LANE) == 0:
        tT //= 2
        nT = T_pad // tT

    # --- zero-pad operands (outside the kernel, only when needed) ------------
    x = latents
    if T_pad != T:
        x = jnp.pad(x, ((0, 0), (0, 0), (0, T_pad - T)))
    w = w_cd
    b = bias_row
    if D_pad != D:
        w = jnp.pad(w, ((0, 0), (0, D_pad - D)))
        b = jnp.pad(b, ((0, 0), (0, D_pad - D)))

    grid = (B, nT)

    x_spec = pl.BlockSpec((None, C, tT), lambda bi, ti: (bi, 0, ti))
    w_spec = pl.BlockSpec((C, D_pad), lambda bi, ti: (0, 0))      # VMEM resident
    b_spec = pl.BlockSpec((1, D_pad), lambda bi, ti: (0, 0))      # VMEM resident
    o_spec = pl.BlockSpec((None, tT, D_pad), lambda bi, ti: (bi, ti, 0))

    footprint = 2 * tT * (D_pad * o_isz + C * x_isz) + w_resident
    vmem_limit = int(min(max(footprint + (8 << 20), 32 << 20), 48 << 20))

    cost = pl.CostEstimate(
        flops=2 * B * T_pad * C * D_pad,
        transcendentals=0,
        bytes_accessed=(B * C * T_pad * x_isz            # input read
                        + C * D_pad * w_isz + D_pad * w_isz   # weight + bias
                        + B * T_pad * D_pad * o_isz),     # dominant output write
    )

    out = pl.pallas_call(
        _embed_kernel,
        out_shape=jax.ShapeDtypeStruct((B, T_pad, D_pad), out_dtype),
        grid=grid,
        in_specs=[x_spec, w_spec, b_spec],
        out_specs=o_spec,
        compiler_params=pltpu.CompilerParams(
            dimension_semantics=("parallel", "parallel"),
            vmem_limit_bytes=vmem_limit),
        cost_estimate=cost,
    )(x, w, b)

    if T_pad != T or D_pad != D:
        out = out[:, :T, :D]
    return out


# ------------------------------ parameters -----------------------------------

def init_params(key, n_codebooks, latent_dim, d_model):
    C = n_codebooks * latent_dim
    kw, kb = jax.random.split(key)
    # torch Conv1d(kernel_size=1) weight is [D, C, 1]; keep the torch layout
    # for the reference and pre-transpose ONCE to [C, D] for the kernel.
    w_torch = (0.02 * jax.random.normal(kw, (d_model, C))).astype(jnp.float32)
    bias = (0.02 * jax.random.normal(kb, (d_model,))).astype(jnp.float32)
    return {
        "w_torch": w_torch,                     # [D, C]  (reference layout)
        "w_cd": jnp.transpose(w_torch),         # [C, D]  (kernel layout, done once)
        "b_row": bias.reshape(1, d_model),      # [1, D]
        "b": bias,
    }


def _reference(latents, w_torch, bias):
    # Conv1d(k=1) == channel contraction, then transpose(1, 2)
    return jnp.einsum("bct,dc->btd", latents, w_torch) + bias


# --------------------------------- main ---------------------------------------

if __name__ == "__main__":
    key = jax.random.PRNGKey(0)
    k1, k2, k3, k4 = jax.random.split(key, 4)

    # ---- test 1: toy shape, fp32 output, exact parity with the module -------
    n_codebooks, latent_dim, d_model = 4, 8, 128
    B, T = 2, 8
    C = n_codebooks * latent_dim
    params = init_params(k1, n_codebooks, latent_dim, d_model)
    latents = jax.random.normal(k2, (B, C, T), dtype=jnp.float32)

    out = vampnet_embedding(latents, params["w_cd"], params["b_row"])
    out = jax.block_until_ready(out)
    ref = _reference(latents, params["w_torch"], params["b"])

    assert out.shape == (B, T, d_model), out.shape
    assert bool(jnp.all(jnp.isfinite(out)))
    assert bool(jnp.allclose(out, ref, atol=1e-5, rtol=1e-5)), "fp32 mismatch"

    # ---- test 2: non-128-multiple T and D (padding path) + bf16 output ------
    n_codebooks2, latent_dim2, d_model2 = 4, 8, 160     # D=160 -> padded to 256
    B2, T2 = 1, 200                                     # small full-dim T tile
    params2 = init_params(k3, n_codebooks2, latent_dim2, d_model2)
    latents2 = jax.random.normal(k4, (B2, n_codebooks2 * latent_dim2, T2),
                                 dtype=jnp.float32)

    out2 = vampnet_embedding(latents2, params2["w_cd"], params2["b_row"],
                             out_dtype=jnp.bfloat16)
    out2 = jax.block_until_ready(out2)
    ref2 = _reference(latents2, params2["w_torch"], params2["b"])

    assert out2.shape == (B2, T2, d_model2), out2.shape
    assert out2.dtype == jnp.bfloat16
    assert bool(jnp.all(jnp.isfinite(out2.astype(jnp.float32))))
    assert bool(jnp.allclose(out2.astype(jnp.float32), ref2,
                             atol=1e-2, rtol=1e-2)), "bf16 mismatch"

    print("KERNEL_OK")
</pallas_src>

<mosaic_0001>
module attributes {stable_mosaic.version = 11 : i64} {
  func.func @_embed_kernel(%arg0: i32, %arg1: i32, %arg2: memref<1x32x8xf32, #tpu.memory_space<vmem>>, %arg3: memref<32x128xf32, #tpu.memory_space<vmem>>, %arg4: memref<1x128xf32, #tpu.memory_space<vmem>>, %arg5: memref<1x8x128xf32, #tpu.memory_space<vmem>>) attributes {dimension_semantics = [#tpu.dimension_semantics<parallel>, #tpu.dimension_semantics<parallel>], iteration_bounds = array<i64: 2, 1>, scalar_prefetch = 0 : i64, scratch_operands = 0 : i64, tpu.core_type = #tpu.core_type<tc>, window_params = [{transform_indices = @transform_0, window_bounds = array<i64: 1, 32, 8>}, {pipeline_mode = #tpu.pipeline_mode<synchronous>, transform_indices = @transform_1, window_bounds = array<i64: 32, 128>}, {pipeline_mode = #tpu.pipeline_mode<synchronous>, transform_indices = @transform_2, window_bounds = array<i64: 1, 128>}, {transform_indices = @transform_3, window_bounds = array<i64: 1, 8, 128>}]} {
    %c0 = arith.constant 0 : index
    %c0_0 = arith.constant 0 : index
    %c0_1 = arith.constant 0 : index
    %0 = vector.load %arg2[%c0, %c0_0, %c0_1] : memref<1x32x8xf32, #tpu.memory_space<vmem>>, vector<1x32x8xf32>
    %1 = vector.shape_cast %0 : vector<1x32x8xf32> to vector<32x8xf32>
    %c0_2 = arith.constant 0 : index
    %c0_3 = arith.constant 0 : index
    %2 = vector.load %arg3[%c0_2, %c0_3] : memref<32x128xf32, #tpu.memory_space<vmem>>, vector<32x128xf32>
    %cst = arith.constant dense<0.000000e+00> : vector<8x128xf32>
    %3 = tpu.matmul %1, %2, %cst {dimension_numbers = #tpu.dot_dimension_numbers<[0], [0], [1], [1], [0, 1, 1, 1], [], []>} : vector<32x8xf32>, vector<32x128xf32>, vector<8x128xf32> -> vector<8x128xf32>
    %c0_4 = arith.constant 0 : index
    %c0_5 = arith.constant 0 : index
    %4 = vector.load %arg4[%c0_4, %c0_5] : memref<1x128xf32, #tpu.memory_space<vmem>>, vector<1x128xf32>
    %5 = vector.broadcast %4 : vector<1x128xf32> to vector<8x128xf32>
    %6 = arith.addf %3, %5 : vector<8x128xf32>
    %c0_6 = arith.constant 0 : index
    %c0_7 = arith.constant 0 : index
    %c0_8 = arith.constant 0 : index
    %7 = vector.load %arg5[%c0_6, %c0_7, %c0_8] : memref<1x8x128xf32, #tpu.memory_space<vmem>>, vector<1x8x128xf32>
    %8 = vector.shape_cast %7 : vector<1x8x128xf32> to vector<8x128xf32>
    %9 = vector.shape_cast %6 : vector<8x128xf32> to vector<1x8x128xf32>
    tpu.vector_store %arg5[%c0_6, %c0_7, %c0_8], %9 {strides = array<i32>} : memref<1x8x128xf32, #tpu.memory_space<vmem>>, vector<1x8x128xf32>,
    return
  }
  func.func @transform_0(%arg0: i32, %arg1: i32) -> (i32, i32, i32) {
    %c0_i32 = arith.constant 0 : i32
    %c0_i32_0 = arith.constant 0 : i32
    return %arg0, %c0_i32, %arg1 : i32, i32, i32
  }
  func.func @transform_1(%arg0: i32, %arg1: i32) -> (i32, i32) {
    %c0_i32 = arith.constant 0 : i32
    %c0_i32_0 = arith.constant 0 : i32
    %c0_i32_1 = arith.constant 0 : i32
    return %c0_i32, %c0_i32_0 : i32, i32
  }
  func.func @transform_2(%arg0: i32, %arg1: i32) -> (i32, i32) {
    %c0_i32 = arith.constant 0 : i32
    %c0_i32_0 = arith.constant 0 : i32
    %c0_i32_1 = arith.constant 0 : i32
    return %c0_i32, %c0_i32_0 : i32, i32
  }
  func.func @transform_3(%arg0: i32, %arg1: i32) -> (i32, i32, i32) {
    %c0_i32 = arith.constant 0 : i32
    %c0_i32_0 = arith.constant 0 : i32
    return %arg0, %arg1, %c0_i32 : i32, i32, i32
  }
}

</mosaic_0001>

<bundles_post_ra>
// kernel: tpu_custom_call.1
= control target key start
LH: loop header
LB: loop body
LE: loop exit
PB: predicated region body
PF: predicated region fallthrough
CT: control target
= control target key end

     0   :  { %8 = vsyncpa [#allocation3], 0  ;;  %s731_s0 = inlined_call_operand.vmem [shape: f32[2,32,8], index: 0, kind: input, shape index: {}]   ;;  %s732_s1 = inlined_call_operand.vmem [shape: f32[32,128], index: 1, kind: input, shape index: {}]   ;;  %s733_s2 = inlined_call_operand.vmem [shape: f32[1,128], index: 2, kind: input, shape index: {}]   ;;  %s734_s3 = inlined_call_operand.hbm [shape: f32[2,8,128], index: 3, kind: output, shape index: {}]  }
   0x1   :  { %10 = vsyncpa [#allocation3 + $0x1], 0  ;;  %s604_s12 = smov 0   ;;  %s606_s13 = smov 0  }
   0x2   :  { %s608_s14 = smov 0   ;;  %s610_s15 = smov 0  }
   0x3   :  { %s612_s16 = smov 0   ;;  %s614_s17 = smov 0  }
   0x4 LB: > { %s405_s18 = sadd.s32 4294967295, %s578_s17   ;;  %s406_s19 = sadd.s32 4294967294, %s578_s17   ;;  %s578_s17 = sphi %s614_s17, %s16_s17   ;;  %s574_s16 = sphi %s612_s16, %s741_s16   ;;  %s570_s15 = sphi %s610_s15, %s740_s15   ;;  %s566_s14 = sphi %s608_s14, %s739_s14   ;;  %s562_s13 = sphi %s606_s13, %s738_s13   ;;  %s558_s12 = sphi %s604_s12, %s737_s12  }
   0x5   : > { %s28_s20 = sadd.s32 1, %s574_s16  ;;  %s107_s21 = sadd.s32 1, %s566_s14 }
   0x6   : > { %p30_p0 = scmp.ge.s32.totalorder %s28_s20, 2  ;;  %p117_p1 = scmp.ne.s32.totalorder %s566_s14, %s562_s13 }
   0x7   : > { %p118_p2 = scmp.eq.s32.totalorder %s405_s18, 1  ;;  %p123_p3 = scmp.ne.s32.totalorder %s562_s13, %s558_s12 }
   0x8   : > { %s743_s20 = smov (%p30_p0, %s28_s20), 0  ;;  %p124_p5 = scmp.eq.s32.totalorder %s406_s19, 1 }
   0x9   : > { %p644_p4 = por %p118_p2, %p117_p1  ;;  %s102_s23 = ssub.s32 %s574_s16, %s743_s20 }
   0xa   : > { %p409_p6 = scmp.ge.s32.totalorder %s578_s17, 1  ;;  %p105_p7 = scmp.eq.s32.totalorder %s102_s23, 0 }
   0xb   : > { %p651_p8 = por %p124_p5, %p123_p3  ;;  %p159_p9 = scmp.lt.s32.totalorder %s578_s17, 3 }
   0xc   : > { %s657_s25 = scalar_select %p105_p7, %s566_s14, %s107_s21  }
   0xd   : > { %p160_p10 = pnand %p409_p6, %p159_p9 }
   0xe   : > { %p186_p11 = scmp.lt.s32.totalorder (!%p160_p10), %s570_s15, 1  ;;  %v198_v0 = vld [vmem:[%s732_s1] sm:$0xff] (!%p160_p10)  ;;  %v199_v1 = vld [vmem:[%s732_s1 + $0x8] sm:$0xff] (!%p160_p10)  ;;  %v200_v2 = vld [vmem:[%s732_s1 + $0x10] sm:$0xff] (!%p160_p10)  ;;  %v580_v3 = vmov (!%p160_p10), 0.0|0.0   ;;  %vm581_vm0 = vmmov (!%p160_p10), 0  }
   0xf   : > { %163 = sbr.rel (%p160_p10) target bundleno = 384 (0x180), region = 32  ;;  %436 = vmatprep.subr.bf16.mxu0 (!%p160_p10), %v580_v3  ;;  %v437_v4 = vpack.c.bf16 (!%p160_p10), %v199_v1, %v198_v0  ;;  %v201_v5 = vld [vmem:[%s732_s1 + $0x18] sm:$0xff] (!%p160_p10)  ;;  %v582_v6 = vmov (!%p160_p10), 0.0   ;;  %vm241_vm1 = vcmask (!%p160_p10), 261120   ;;  %s183_s18 = sand.u32 (!%p160_p10), 1, %s562_s13  }
  0x10   : > { %433 = vmatprep.mubr.msk.f32.mxu0 (!%p160_p10), %vm581_vm0, %v582_v6  ;;  %v440_v7 = vpack.c.bf16 (!%p160_p10), %v201_v5, %v200_v2  ;;  %s410_s19 = sshll.u32 (!%p160_p10), %s183_s18, 3  ;;  %v413_v13 = vld [vmem:[%s733_s2] ss:$0 sm:$0xff] (!%p160_p10)  ;;  %s416_s26 = sshll.u32 (!%p160_p10), %s570_s15, 7 }
  0x11   : > { %438 = vmatpush3.bf16.msra.mxu0 (!%p160_p10), %v437_v4  ;;  %s185_s27 = scalar_lea.vmem (!%p160_p10), [#allocation2], %s410_s19  ;;  %s684_s4 = scalar_lea.hbm (!%p160_p10), %s734_s3, %s416_s26 }
  0x12   : > { %439 = vmatprep.subr.bf16.mxu0 (!%p160_p10), %v580_v3  ;;  %s331_s28 = sshll.u32 (!%p160_p10), %s185_s27, 4  ;;  %s317_s5 = scalar_lea.sflag (!%p160_p10), [#allocation3], %s183_s18  ;;  %s686_s28 = int_to_ptr.vmem [resolvable:$true] %s331_s28 }
  0x13   : > { %s500_s6 = scalar_lea.vmem (!%p160_p10), %s686_s28, 128 }
  0x14   : > { %p501_p12 = scmp.ne.s32.totalorder (!%p160_p10), %s686_s28, %s500_s6 }
  0x15   : > { %441 = vmatpush3.bf16.msra.mxu0 (!%p160_p10), %v440_v7 }
  0x16   : > { %s187_s7 = scalar_select %p186_p11, %s570_s15, 1 }
  0x17   : > { %p502_p13 = pnand %p501_p12, %p644_p4  ;;  %s583_s15 = smov [#allocation2]  }
  0x18   : > { %s419_s8 = sshll.u32 %s187_s7, 5  ;;  %s504_s7 = sshll.u32 %s583_s15, 4  ;;  %s505_s7 = int_to_ptr.vmem [resolvable:$false] %s504_s7 }
  0x19   : > { %s193_s11 = scalar_lea.vmem %s731_s0, %s419_s8  ;;  %p503_p0 = pneg %p502_p13 }
  0x1a   : > { %v194_v8 = vld [vmem:[%s193_s11] sm:$0xff]  ;;  %v195_v9 = vld [vmem:[%s193_s11 + $0x8] sm:$0xff]  ;;  %v196_v10 = vld [vmem:[%s193_s11 + $0x10] sm:$0xff]  ;;  %s506_s8 = scalar_lea.vmem %s505_s7, 256  ;;  %p507_p1 = scmp.lt.s32.totalorder %s686_s28, %s505_s7 }
  0x1b   : > { %209 = vxpose.xlu0.b32.start [1/4] (short) (narrow) %v194_v8, 8  ;;  %v197_v11 = vld [vmem:[%s193_s11 + $0x18] sm:$0xff]  ;;  %p508_p2 = scmp.lt.s32.totalorder %s506_s8, %s500_s6 }
  0x1d   : > { %p509_p3 = por %p508_p2, %p507_p1 }
  0x1f   : > { %210 = vxpose.xlu0.b32.cont [2/4] (short) (narrow) %v195_v9, 8  ;;  %p510_p5 = pnand %p509_p3, %p503_p0 }
  0x23   : > { %211 = vxpose.xlu0.b32.cont [3/4] (short) (narrow) %v196_v10, 8 }
  0x27   : > { %212 = vxpose.xlu0.b32.end [4/4] (short) (narrow) %v197_v11, 8 }
  0x9b   : > { %v225_v12 = vpop.trf.xlu0 }
  0x9c   : > { %434 = vmatmul.mubr.msk.f32.vlgmr.msra.gmra.mrb[0].mxu0 %vm241_vm1, %v225_v12 }
 0x16f   : > { %v311_v14 = vpop.f32.mrb[0].mxu0 }
 0x170   : > { %v312_v15 = vadd.f32 %v413_v13, %v311_v14  ;;  %v435_v16 = vpop.f32.mrb[1].mxu0 }
 0x172   : > { %315 = vst [vmem:[%s185_s27] sm:$0xff] %v312_v15 }
 0x173   : > { %513 = shalt.err (!%p510_p5)
}
 0x174   : > { %s514_s9 = scalar_lea.hbm %s684_s4, 128  ;;  %s518_s18 = scalar_lea.hbm %s734_s3, 256 }
 0x175   : > { %p515_p6 = scmp.ne.s32.totalorder %s684_s4, %s514_s9  ;;  %p519_p10 = scmp.lt.u32.totalorder %s684_s4, %s734_s3 }
 0x176   : > { %p520_p11 = scmp.lt.u32.totalorder %s518_s18, %s514_s9  ;;  %p522_p13 = scmp.lt.u32.totalorder %s514_s9, %s684_s4 }
 0x177   : > { %p516_p7 = pnand %p515_p6, %p644_p4 }
 0x178   : > { %p521_p12 = por %p520_p11, %p519_p10 }
 0x179   : > { %p517_p9 = pneg %p516_p7 }
 0x17a   : > { %p523_p0 = por %p522_p13, %p521_p12 }
 0x17c   : > { %p524_p1 = pnand %p523_p0, %p517_p9 }
 0x17e   : > { %527 = shalt.err (!%p524_p1)
}
 0x17f   : > { %442 = dma.vmem_to_hbm [thread:$0]  (%p644_p4), %s686_s28, 128, %s684_s4, %s317_s5  }
 0x180 PF: > { %p448_p2 = scmp.ge.s32.totalorder %s578_s17, 2  ;;  %s343_s23 = sand.u32 1, %s558_s12  }
 0x181   : > { %s344_s26 = scalar_lea.sflag [#allocation3], %s343_s23 }
 0x182   : > { %p445_p3 = pnand %p448_p2, %p651_p8 }
 0x184   : > { %553 = dma.done.wait (!%p445_p3), %s344_s26, 128  }
 0x185   : > { %555 = vsyncadd (!%p445_p3), %s344_s26, 4294967168  ;;  %s16_s17 = sadd.s32 1, %s578_s17   ;;  %s737_s12 = smov %s562_s13 }
 0x186   : > { %p13_p5 = scmp.ge.s32.totalorder %s16_s17, 4   ;;  %s738_s13 = smov %s566_s14 }
 0x187   : > { %s739_s14 = smov %s657_s25  ;;  %s740_s15 = smov %s574_s16 }
 0x188   : > { %s741_s16 = smov %s743_s20  ;;  %15 = sbr.rel (!%p13_p5) target bundleno = 4 (0x4), region = 67 }
 0x18f   :  { %349 = vsyncpa [#allocation3], 1 }
 0x190   :  { %351 = vsyncpa [#allocation3 + $0x1], 1 }

</bundles_post_ra>
